<compile_context>
chip_gen: v6e
topology: v6e:2x2x1
jax: 0.10.0
libtpu: 0.0.40
codegen_flags: <defaults>
</compile_context>

<pallas_src>
import functools

import jax
import jax.numpy as jnp
from jax.experimental import pallas as pl
from jax.experimental.pallas import tpu as pltpu


def _lora_kernel(x_ref, a_t_ref, b_t_ref, bias_ref, o_ref, *, scale):
    # x_ref:    (TN, in_features)
    # a_t_ref:  (in_features, rank)   -- pre-transposed lora_A (grid-invariant)
    # b_t_ref:  (rank, TOUT)          -- pre-transposed lora_B tile
    # bias_ref: (1, TOUT)
    # o_ref:    (TN, TOUT)
    xa = jnp.dot(x_ref[...], a_t_ref[...], preferred_element_type=jnp.float32)
    out = jnp.dot(xa, b_t_ref[...].astype(jnp.float32),
                  preferred_element_type=jnp.float32)
    o_ref[...] = (out * scale + bias_ref[...].astype(jnp.float32)).astype(
        o_ref.dtype)


def _round_up(v, m):
    return ((v + m - 1) // m) * m


def _row_multiple(dtype):
    itemsize = jnp.dtype(dtype).itemsize
    if itemsize >= 4:
        return 8
    if itemsize == 2:
        return 16
    return 32


def _vmem_capacity_bytes():
    try:
        return int(pltpu.get_tpu_info().vmem_capacity_bytes)
    except Exception:
        return 128 * 1024 * 1024


def _default_vmem_budget(phys):
    if phys <= 80 * 1024 * 1024:
        # v7x-class part: 64 MiB / TensorCore -> leave room for Mosaic scratch.
        return int(phys * 0.55)
    # v5e / v6e: 128 MiB -> larger budget keeps TN at 512 for very wide layers.
    return min(96 * 1024 * 1024, int(phys * 0.70))


def _choose_tiles(n, in_features, rank, out_p, dtype_bytes, row_mult, budget):
    """Pick (row tile, out tile) so double-buffered tiles + weights fit VMEM."""
    # Output tile: lane-dense (multiple of 128), capped so very wide layers
    # don't force the row tile below the ~512-row HBM-roofline sweet spot.
    TOUT_MAX = 2048
    tout = out_p if out_p <= TOUT_MAX else TOUT_MAX

    in_pad = _round_up(in_features, 128)       # x lanes padded to 128
    rank_lanes = _round_up(rank, 128)          # rank lane-padded buffers
    rank_sub = _round_up(rank, 8)              # rank sublane-padded buffers

    # Per-output-row VMEM bytes: double-buffered x/out tiles + f32 xa
    # intermediate (rank lane-padded) + f32 accumulator before the final cast.
    per_row = (2 * in_pad * dtype_bytes
               + 2 * tout * dtype_bytes
               + rank_lanes * 4
               + tout * 4)

    # a_t is single-buffered (grid-invariant); b_t / bias tiles are tiny and
    # counted double-buffered.
    weight_bytes = (in_features * rank_lanes * dtype_bytes
                    + 2 * rank_sub * tout * dtype_bytes
                    + 2 * 8 * tout * dtype_bytes)

    avail = max(budget - weight_bytes, per_row * row_mult)
    tn = max(row_mult, min(512, avail // per_row))
    tn = (tn // row_mult) * row_mult
    tn = min(tn, _round_up(n, row_mult))
    if tn >= 128:
        tn = (tn // 128) * 128
    tn = max(tn, row_mult)

    # v7x megacore: make sure the grid has >= 2 steps so both TensorCores get
    # work (harmless on single-core parts).
    if pl.cdiv(n, tn) * pl.cdiv(out_p, tout) < 2 and n > row_mult:
        tn = min(tn, _round_up(pl.cdiv(n, 2), row_mult))

    return tn, tout, weight_bytes, per_row


def lora_forward(x, lora_A, lora_B, lora_bias, *, alpha=1.0, tn=None,
                 tout=None, vmem_budget_bytes=None):
    """LoRA forward.

    x:         (batch, seq, in_features)
    lora_A:    (rank, in_features)
    lora_B:    (out_features, rank)
    lora_bias: (out_features,)
    Returns    (batch, seq, out_features)
    """
    rank, in_features = lora_A.shape
    out_features = lora_B.shape[0]
    batch, seq, _ = x.shape
    n = batch * seq
    scale = float(alpha) / float(rank)
    dtype_bytes = jnp.dtype(x.dtype).itemsize
    row_mult = _row_multiple(x.dtype)

    phys = _vmem_capacity_bytes()
    if vmem_budget_bytes is None:
        vmem_budget_bytes = _default_vmem_budget(phys)

    out_p = _round_up(out_features, 128)

    auto_tn, auto_tout, weight_bytes, per_row = _choose_tiles(
        n, in_features, rank, out_p, dtype_bytes, row_mult, vmem_budget_bytes)
    if tn is None:
        tn = auto_tn
    if tout is None:
        tout = auto_tout

    x2d = x.reshape(n, in_features)
    # One-time wrapper-side transposes: no per-step XLU work in-kernel, and
    # out_features lands on the lane axis of b_t.
    a_t = lora_A.T                       # (in_features, rank)
    b_t = lora_B.T                       # (rank, out_features)
    bias2d = lora_bias.reshape(1, out_features)
    if out_p != out_features:
        # Lane-dense output: pad weights/bias once; unmasked vst stores.
        b_t = jnp.pad(b_t, ((0, 0), (0, out_p - out_features)))
        bias2d = jnp.pad(bias2d, ((0, 0), (0, out_p - out_features)))

    grid = (pl.cdiv(n, tn), pl.cdiv(out_p, tout))

    # VMEM ceiling: conservative (covers a double-buffered a_t in case the
    # single-buffer request is unavailable), clamped below physical VMEM.
    vmem_limit = tn * per_row + 2 * weight_bytes + (4 << 20)
    vmem_limit = max(vmem_limit, 16 << 20)
    vmem_limit = min(vmem_limit, phys - (2 << 20))

    cost = pl.CostEstimate(
        flops=2 * n * rank * (in_features + out_p),
        transcendentals=0,
        bytes_accessed=(n * (in_features + out_p) * dtype_bytes
                        + (in_features * rank + rank * out_p + out_p)
                        * dtype_bytes),
    )

    kernel = functools.partial(_lora_kernel, scale=scale)
    out_shape = jax.ShapeDtypeStruct((n, out_p), x.dtype)

    def make_call(single_buffer_a):
        a_kwargs = {}
        buffered = getattr(pl, "Buffered", None)
        if single_buffer_a and buffered is not None:
            # a_t's block index is constant across the whole grid: one buffer
            # is enough; double-buffering it only wastes VMEM.
            a_kwargs = dict(pipeline_mode=buffered(1))
        return pl.pallas_call(
            kernel,
            out_shape=out_shape,
            grid_spec=pltpu.PrefetchScalarGridSpec(
                num_scalar_prefetch=0,
                grid=grid,
                in_specs=[
                    # x block index constant across j (inner grid axis):
                    # fetched once per row tile, no re-DMA per out tile.
                    pl.BlockSpec((tn, in_features), lambda i, j: (i, 0)),
                    pl.BlockSpec((in_features, rank), lambda i, j: (0, 0),
                                 **a_kwargs),
                    pl.BlockSpec((rank, tout), lambda i, j: (0, j)),
                    pl.BlockSpec((1, tout), lambda i, j: (0, j)),
                ],
                out_specs=pl.BlockSpec((tn, tout), lambda i, j: (i, j)),
            ),
            compiler_params=pltpu.CompilerParams(
                dimension_semantics=("parallel", "parallel"),
                vmem_limit_bytes=int(vmem_limit),
            ),
            cost_estimate=cost,
        )

    try:
        out2d = make_call(True)(x2d, a_t, b_t, bias2d)
    except Exception:
        # pipeline_mode single-buffering unavailable on this JAX build:
        # fall back to default double-buffering (same semantics).
        out2d = make_call(False)(x2d, a_t, b_t, bias2d)

    if out_p != out_features:
        out2d = out2d[:, :out_features]
    return out2d.reshape(batch, seq, out_features)


if __name__ == "__main__":
    # Small shapes consistent with the module: a linear-style LoRA adapter.
    batch, seq = 2, 8
    in_features, out_features, rank = 32, 32, 4
    alpha = 1.0

    key = jax.random.PRNGKey(0)
    kx, ka, kb, kbias = jax.random.split(key, 4)

    # Module init uses normal(std=1/rank) for A and zeros for B/bias; use
    # non-zero deterministic values for B/bias so the output is non-trivial.
    lora_A = (1.0 / rank) * jax.random.normal(ka, (rank, in_features),
                                              jnp.float32)
    lora_B = 0.02 * jax.random.normal(kb, (out_features, rank), jnp.float32)
    lora_bias = 0.01 * jax.random.normal(kbias, (out_features,), jnp.float32)

    x = jax.random.normal(kx, (batch, seq, in_features), jnp.float32)

    out = lora_forward(x, lora_A, lora_B, lora_bias, alpha=alpha)
    out = jax.block_until_ready(out)

    # Plain-JAX reference of the PyTorch forward (original_layer=None,
    # dropout=0, bias=True).
    ref = (x @ lora_A.T @ lora_B.T) * (alpha / rank) + lora_bias

    assert out.shape == (batch, seq, out_features)
    assert jnp.allclose(out, ref, atol=1e-5, rtol=1e-5), "mismatch vs reference"
    print("KERNEL_OK")
</pallas_src>

<mosaic_0001>
module attributes {stable_mosaic.version = 11 : i64} {
  func.func @_lora_kernel(%arg0: i32, %arg1: i32, %arg2: memref<8x32xf32, #tpu.memory_space<vmem>>, %arg3: memref<32x4xf32, #tpu.memory_space<vmem>>, %arg4: memref<4x128xf32, #tpu.memory_space<vmem>>, %arg5: memref<1x128xf32, #tpu.memory_space<vmem>>, %arg6: memref<8x128xf32, #tpu.memory_space<vmem>>) attributes {dimension_semantics = [#tpu.dimension_semantics<parallel>, #tpu.dimension_semantics<parallel>], iteration_bounds = array<i64: 2, 1>, scalar_prefetch = 0 : i64, scratch_operands = 0 : i64, tpu.core_type = #tpu.core_type<tc>, window_params = [{transform_indices = @transform_0, window_bounds = array<i64: 8, 32>}, {pipeline_mode = #tpu.pipeline_mode<synchronous>, transform_indices = @transform_1, window_bounds = array<i64: 32, 4>}, {transform_indices = @transform_2, window_bounds = array<i64: 4, 128>}, {transform_indices = @transform_3, window_bounds = array<i64: 1, 128>}, {transform_indices = @transform_4, window_bounds = array<i64: 8, 128>}]} {
    %c0 = arith.constant 0 : index
    %c0_0 = arith.constant 0 : index
    %0 = vector.load %arg2[%c0, %c0_0] : memref<8x32xf32, #tpu.memory_space<vmem>>, vector<8x32xf32>
    %c0_1 = arith.constant 0 : index
    %c0_2 = arith.constant 0 : index
    %1 = vector.load %arg3[%c0_1, %c0_2] : memref<32x4xf32, #tpu.memory_space<vmem>>, vector<32x4xf32>
    %cst = arith.constant dense<0.000000e+00> : vector<8x4xf32>
    %2 = tpu.matmul %0, %1, %cst {dimension_numbers = #tpu.dot_dimension_numbers<[1], [0], [0], [1], [0, 0, 1, 1], [], []>} : vector<8x32xf32>, vector<32x4xf32>, vector<8x4xf32> -> vector<8x4xf32>
    %c0_3 = arith.constant 0 : index
    %c0_4 = arith.constant 0 : index
    %3 = vector.load %arg4[%c0_3, %c0_4] : memref<4x128xf32, #tpu.memory_space<vmem>>, vector<4x128xf32>
    %cst_5 = arith.constant dense<0.000000e+00> : vector<8x128xf32>
    %4 = tpu.matmul %2, %3, %cst_5 {dimension_numbers = #tpu.dot_dimension_numbers<[1], [0], [0], [1], [0, 0, 1, 1], [], []>} : vector<8x4xf32>, vector<4x128xf32>, vector<8x128xf32> -> vector<8x128xf32>
    %cst_6 = arith.constant 2.500000e-01 : f32
    %5 = vector.broadcast %cst_6 : f32 to vector<8x128xf32>
    %6 = arith.mulf %4, %5 : vector<8x128xf32>
    %c0_7 = arith.constant 0 : index
    %c0_8 = arith.constant 0 : index
    %7 = vector.load %arg5[%c0_7, %c0_8] : memref<1x128xf32, #tpu.memory_space<vmem>>, vector<1x128xf32>
    %8 = vector.broadcast %7 : vector<1x128xf32> to vector<8x128xf32>
    %9 = arith.addf %6, %8 : vector<8x128xf32>
    %c0_9 = arith.constant 0 : index
    %c0_10 = arith.constant 0 : index
    %10 = vector.load %arg6[%c0_9, %c0_10] : memref<8x128xf32, #tpu.memory_space<vmem>>, vector<8x128xf32>
    tpu.vector_store %arg6[%c0_9, %c0_10], %9 {strides = array<i32>} : memref<8x128xf32, #tpu.memory_space<vmem>>, vector<8x128xf32>,
    return
  }
  func.func @transform_0(%arg0: i32, %arg1: i32) -> (i32, i32) {
    %c0_i32 = arith.constant 0 : i32
    %c0_i32_0 = arith.constant 0 : i32
    return %arg0, %c0_i32 : i32, i32
  }
  func.func @transform_1(%arg0: i32, %arg1: i32) -> (i32, i32) {
    %c0_i32 = arith.constant 0 : i32
    %c0_i32_0 = arith.constant 0 : i32
    %c0_i32_1 = arith.constant 0 : i32
    return %c0_i32, %c0_i32_0 : i32, i32
  }
  func.func @transform_2(%arg0: i32, %arg1: i32) -> (i32, i32) {
    %c0_i32 = arith.constant 0 : i32
    %c0_i32_0 = arith.constant 0 : i32
    return %c0_i32, %arg1 : i32, i32
  }
  func.func @transform_3(%arg0: i32, %arg1: i32) -> (i32, i32) {
    %c0_i32 = arith.constant 0 : i32
    %c0_i32_0 = arith.constant 0 : i32
    return %c0_i32, %arg1 : i32, i32
  }
  func.func @transform_4(%arg0: i32, %arg1: i32) -> (i32, i32) {
    %c0_i32 = arith.constant 0 : i32
    return %arg0, %arg1 : i32, i32
  }
}

module attributes {stable_mosaic.version = 11 : i64} {
  func.func @_lora_kernel(%arg0: i32, %arg1: i32, %arg2: memref<8x32xf32, #tpu.memory_space<vmem>>, %arg3: memref<32x4xf32, #tpu.memory_space<vmem>>, %arg4: memref<4x128xf32, #tpu.memory_space<vmem>>, %arg5: memref<1x128xf32, #tpu.memory_space<vmem>>, %arg6: memref<8x128xf32, #tpu.memory_space<vmem>>) attributes {dimension_semantics = [#tpu.dimension_semantics<parallel>, #tpu.dimension_semantics<parallel>], iteration_bounds = array<i64: 2, 1>, scalar_prefetch = 0 : i64, scratch_operands = 0 : i64, tpu.core_type = #tpu.core_type<tc>, window_params = [{transform_indices = @transform_0, window_bounds = array<i64: 8, 32>}, {pipeline_mode = #tpu.pipeline_mode<synchronous>, transform_indices = @transform_1, window_bounds = array<i64: 32, 4>}, {transform_indices = @transform_2, window_bounds = array<i64: 4, 128>}, {transform_indices = @transform_3, window_bounds = array<i64: 1, 128>}, {transform_indices = @transform_4, window_bounds = array<i64: 8, 128>}]} {
    %c0 = arith.constant 0 : index
    %c0_0 = arith.constant 0 : index
    %0 = vector.load %arg2[%c0, %c0_0] : memref<8x32xf32, #tpu.memory_space<vmem>>, vector<8x32xf32>
    %c0_1 = arith.constant 0 : index
    %c0_2 = arith.constant 0 : index
    %1 = vector.load %arg3[%c0_1, %c0_2] : memref<32x4xf32, #tpu.memory_space<vmem>>, vector<32x4xf32>
    %cst = arith.constant dense<0.000000e+00> : vector<8x4xf32>
    %2 = tpu.matmul %0, %1, %cst {dimension_numbers = #tpu.dot_dimension_numbers<[1], [0], [0], [1], [0, 0, 1, 1], [], []>} : vector<8x32xf32>, vector<32x4xf32>, vector<8x4xf32> -> vector<8x4xf32>
    %c0_3 = arith.constant 0 : index
    %c0_4 = arith.constant 0 : index
    %3 = vector.load %arg4[%c0_3, %c0_4] : memref<4x128xf32, #tpu.memory_space<vmem>>, vector<4x128xf32>
    %cst_5 = arith.constant dense<0.000000e+00> : vector<8x128xf32>
    %4 = tpu.matmul %2, %3, %cst_5 {dimension_numbers = #tpu.dot_dimension_numbers<[1], [0], [0], [1], [0, 0, 1, 1], [], []>} : vector<8x4xf32>, vector<4x128xf32>, vector<8x128xf32> -> vector<8x128xf32>
    %cst_6 = arith.constant 2.500000e-01 : f32
    %5 = vector.broadcast %cst_6 : f32 to vector<8x128xf32>
    %6 = arith.mulf %4, %5 : vector<8x128xf32>
    %c0_7 = arith.constant 0 : index
    %c0_8 = arith.constant 0 : index
    %7 = vector.load %arg5[%c0_7, %c0_8] : memref<1x128xf32, #tpu.memory_space<vmem>>, vector<1x128xf32>
    %8 = vector.broadcast %7 : vector<1x128xf32> to vector<8x128xf32>
    %9 = arith.addf %6, %8 : vector<8x128xf32>
    %c0_9 = arith.constant 0 : index
    %c0_10 = arith.constant 0 : index
    %10 = vector.load %arg6[%c0_9, %c0_10] : memref<8x128xf32, #tpu.memory_space<vmem>>, vector<8x128xf32>
    tpu.vector_store %arg6[%c0_9, %c0_10], %9 {strides = array<i32>} : memref<8x128xf32, #tpu.memory_space<vmem>>, vector<8x128xf32>,
    return
  }
  func.func @transform_0(%arg0: i32, %arg1: i32) -> (i32, i32) {
    %c0_i32 = arith.constant 0 : i32
    %c0_i32_0 = arith.constant 0 : i32
    return %arg0, %c0_i32 : i32, i32
  }
  func.func @transform_1(%arg0: i32, %arg1: i32) -> (i32, i32) {
    %c0_i32 = arith.constant 0 : i32
    %c0_i32_0 = arith.constant 0 : i32
    %c0_i32_1 = arith.constant 0 : i32
    return %c0_i32, %c0_i32_0 : i32, i32
  }
  func.func @transform_2(%arg0: i32, %arg1: i32) -> (i32, i32) {
    %c0_i32 = arith.constant 0 : i32
    %c0_i32_0 = arith.constant 0 : i32
    return %c0_i32, %arg1 : i32, i32
  }
  func.func @transform_3(%arg0: i32, %arg1: i32) -> (i32, i32) {
    %c0_i32 = arith.constant 0 : i32
    %c0_i32_0 = arith.constant 0 : i32
    return %c0_i32, %arg1 : i32, i32
  }
  func.func @transform_4(%arg0: i32, %arg1: i32) -> (i32, i32) {
    %c0_i32 = arith.constant 0 : i32
    return %arg0, %arg1 : i32, i32
  }
}

</mosaic_0001>

<bundles_post_ra>
// kernel: tpu_custom_call.1
= control target key start
LH: loop header
LB: loop body
LE: loop exit
PB: predicated region body
PF: predicated region fallthrough
CT: control target
= control target key end

     0   :  { %9 = vsyncpa [#allocation3], 0  ;;  %s836_s0 = inlined_call_operand.vmem [shape: f32[16,32], index: 0, kind: input, shape index: {}]   ;;  %s837_s1 = inlined_call_operand.vmem [shape: f32[32,4], index: 1, kind: input, shape index: {}]   ;;  %s838_s2 = inlined_call_operand.vmem [shape: f32[4,128], index: 2, kind: input, shape index: {}]   ;;  %s839_s3 = inlined_call_operand.vmem [shape: f32[1,128], index: 3, kind: input, shape index: {}]   ;;  %s840_s4 = inlined_call_operand.hbm [shape: f32[16,128], index: 4, kind: output, shape index: {}]  }
   0x1   :  { %11 = vsyncpa [#allocation3 + $0x1], 0  ;;  %s719_s15 = smov 0   ;;  %s721_s16 = smov 0  }
   0x2   :  { %s723_s17 = smov 0   ;;  %s725_s18 = smov 0  }
   0x3   :  { %s727_s19 = smov 0   ;;  %s729_s20 = smov 0  }
   0x4 LB: > { %s516_s21 = sadd.s32 4294967295, %s689_s20   ;;  %s517_s22 = sadd.s32 4294967294, %s689_s20   ;;  %s689_s20 = sphi %s729_s20, %s17_s20   ;;  %s685_s19 = sphi %s727_s19, %s847_s19   ;;  %s681_s18 = sphi %s725_s18, %s846_s18   ;;  %s677_s17 = sphi %s723_s17, %s845_s17   ;;  %s673_s16 = sphi %s721_s16, %s844_s16   ;;  %s669_s15 = sphi %s719_s15, %s843_s15  }
   0x5   : > { %s29_s23 = sadd.s32 1, %s685_s19  ;;  %s137_s24 = sadd.s32 1, %s677_s17 }
   0x6   : > { %p31_p0 = scmp.ge.s32.totalorder %s29_s23, 2  ;;  %p147_p1 = scmp.ne.s32.totalorder %s677_s17, %s673_s16 }
   0x7   : > { %p148_p2 = scmp.eq.s32.totalorder %s516_s21, 1  ;;  %p153_p3 = scmp.ne.s32.totalorder %s673_s16, %s669_s15 }
   0x8   : > { %s849_s23 = smov (%p31_p0, %s29_s23), 0  ;;  %p154_p5 = scmp.eq.s32.totalorder %s517_s22, 1 }
   0x9   : > { %p759_p4 = por %p148_p2, %p147_p1  ;;  %s132_s26 = ssub.s32 %s685_s19, %s849_s23 }
   0xa   : > { %p522_p6 = scmp.ge.s32.totalorder %s689_s20, 1  ;;  %p135_p7 = scmp.eq.s32.totalorder %s132_s26, 0 }
   0xb   : > { %p766_p8 = por %p154_p5, %p153_p3  ;;  %p195_p9 = scmp.lt.s32.totalorder %s689_s20, 3 }
   0xc   : > { %s772_s28 = scalar_select %p135_p7, %s677_s17, %s137_s24  }
   0xd   : > { %p196_p10 = pnand %p522_p6, %p195_p9 }
   0xe   : > { %p227_p11 = scmp.lt.s32.totalorder (!%p196_p10), %s681_s18, 1  ;;  %s224_s26 = sand.u32 (!%p196_p10), 1, %s673_s16  }
   0xf   : > { %199 = sbr.rel (%p196_p10) target bundleno = 432 (0x1b0), region = 36  ;;  %s523_s29 = sshll.u32 (!%p196_p10), %s224_s26, 3 }
  0x10   : > { %s530_s6 = sshll.u32 (!%p196_p10), %s681_s18, 7  ;;  %s407_s12 = scalar_lea.sflag (!%p196_p10), [#allocation3], %s224_s26 }
  0x11   : > { %s419_s11 = scalar_lea.hbm (!%p196_p10), %s840_s4, %s530_s6  ;;  %s693_s14 = smov (!%p196_p10), [#allocation2]  }
  0x14   : > { %v242_v0 = vld [vmem:[%s837_s1 + $0x18] sm:$0xff]  ;;  %v691_v1 = vmov 0.0   ;;  %v241_v2 = vld [vmem:[%s837_s1 + $0x10] sm:$0xff]  ;;  %vm692_vm0 = vmmov 0   ;;  %s228_s7 = scalar_select %p227_p11, %s681_s18, 1  ;;  %v240_v3 = vld [vmem:[%s837_s1 + $0x8] sm:$0xff] }
  0x15   : > { %540 = vmatprep.subr.mxu0 %v691_v1  ;;  %548 = vmatprep.mubr.msk.f32.mxu0 %vm692_vm0, %v691_v1  ;;  %v239_v4 = vld [vmem:[%s837_s1] sm:$0xff]  ;;  %vm243_vm1 = vcmask 261120   ;;  %vm322_vm2 = vcmask 1043456   ;;  %vm318_vm3 = vcmask 31744  }
  0x16   : > { %541 = vmatpush3.msra.mxu0 %v242_v0  ;;  %551 = vmatprep.subr.mxu1 %v691_v1  ;;  %s524_s10 = sshll.u32 %s228_s7, 3  ;;  %v317_v6 = vld [vmem:[%s838_s2] sm:$0xf]  ;;  %s226_s7 = scalar_lea.vmem [#allocation2], %s523_s29 }
  0x17   : > { %542 = vmatprep.subr.mxu0 %v691_v1  ;;  %553 = vmatprep.mubr.msk.f32.mxu1 %vm692_vm0, %v691_v1  ;;  %s230_s21 = scalar_lea.vmem %s836_s0, %s524_s10  ;;  %v528_v10 = vld [vmem:[%s839_s3] ss:$0 sm:$0xff]  ;;  %s421_s8 = sshll.u32 %s226_s7, 4  ;;  %s422_s8 = int_to_ptr.vmem [resolvable:$true] %s421_s8 }
  0x18   : > { %543 = vmatpush3.msra.mxu0 %v241_v2  ;;  %v238_v5 = vld [vmem:[%s230_s21] sm:$0xff]  ;;  %552 = vmatpush3.msk.msra.mxu1 %vm322_vm2, %v317_v6  ;;  %s613_s13 = scalar_lea.vmem %s422_s8, 128  ;;  %s617_s21 = sshll.u32 %s693_s14, 4  ;;  %s618_s21 = int_to_ptr.vmem [resolvable:$false] %s617_s21 }
  0x19   : > { %544 = vmatprep.subr.mxu0 %v691_v1  ;;  %p614_p12 = scmp.ne.s32.totalorder %s422_s8, %s613_s13  ;;  %s619_s18 = scalar_lea.vmem %s618_s21, 256 }
  0x1a   : > { %545 = vmatpush3.msra.mxu0 %v240_v3  ;;  %p620_p1 = scmp.lt.s32.totalorder %s422_s8, %s618_s21  ;;  %p621_p2 = scmp.lt.s32.totalorder %s619_s18, %s613_s13 }
  0x1b   : > { %546 = vmatprep.subr.mxu0 %v691_v1  ;;  %p615_p13 = pnand %p614_p12, %p759_p4 }
  0x1c   : > { %547 = vmatpush3.msra.mxu0 %v239_v4  ;;  %p622_p3 = por %p621_p2, %p620_p1 }
  0x1d   : > { %549 = vmatmul.mubr.msk.f32.vlgmr.msra.gmra.mxu0 %vm243_vm1, %v238_v5  ;;  %p616_p0 = pneg %p615_p13 }
  0x1f   : > { %p623_p5 = pnand %p622_p3, %p616_p0 }
  0xdd   : > { %v313_v7 = vpop.f32.mrf.mxu0 }
  0xde   : > { %554 = vmatmul.mubr.msk.f32.vlgmr.msra.gmra.mxu1 %vm318_vm3, %v313_v7 }
  0xdf   : > { %v550_v8 = vpop.f32.mrf.mxu0 }
 0x19e   : > { %v392_v9 = vpop.f32.mrf.mxu1 }
 0x19f   : > { %v396_v11 = vmul.f32 0.25, %v392_v9 }
 0x1a0   : > { %v555_v12 = vpop.f32.mrf.mxu1 }
 0x1a1   : > { %v404_v13 = vadd.f32 %v528_v10, %v396_v11 }
 0x1a3   : > { %405 = vst [vmem:[%s226_s7] sm:$0xff] %v404_v13 }
 0x1a4   : > { %626 = shalt.err (!%p623_p5)
}
 0x1a5   : > { %s627_s22 = scalar_lea.hbm %s419_s11, 128  ;;  %s631_s29 = scalar_lea.hbm %s840_s4, 256 }
 0x1a6   : > { %p628_p6 = scmp.ne.s32.totalorder %s419_s11, %s627_s22  ;;  %p632_p10 = scmp.lt.s32.totalorder %s419_s11, %s840_s4 }
 0x1a7   : > { %p633_p11 = scmp.lt.s32.totalorder %s631_s29, %s627_s22 }
 0x1a8   : > { %p629_p7 = pnand %p628_p6, %p759_p4 }
 0x1a9   : > { %p634_p12 = por %p633_p11, %p632_p10 }
 0x1aa   : > { %p630_p9 = pneg %p629_p7 }
 0x1ac   : > { %p635_p13 = pnand %p634_p12, %p630_p9 }
 0x1ae   : > { %638 = shalt.err (!%p635_p13)
}
 0x1af   : > { %556 = dma.vmem_to_hbm [thread:$0]  (%p759_p4), %s422_s8, 128, %s419_s11, %s407_s12  }
 0x1b0 PF: > { %p562_p0 = scmp.ge.s32.totalorder %s689_s20, 2  ;;  %s433_s6 = sand.u32 1, %s669_s15  }
 0x1b1   : > { %s434_s7 = scalar_lea.sflag [#allocation3], %s433_s6 }
 0x1b2   : > { %p559_p1 = pnand %p562_p0, %p766_p8 }
 0x1b4   : > { %p560_p2 = pneg %p559_p1 }
 0x1b6   : > { %664 = dma.done.wait (%p560_p2), %s434_s7, 128  }
 0x1b7   : > { %666 = vsyncadd (%p560_p2), %s434_s7, 4294967168  ;;  %s17_s20 = sadd.s32 1, %s689_s20   ;;  %s843_s15 = smov %s673_s16 }
 0x1b8   : > { %p14_p3 = scmp.ge.s32.totalorder %s17_s20, 4   ;;  %s844_s16 = smov %s677_s17 }
 0x1b9   : > { %s845_s17 = smov %s772_s28  ;;  %s846_s18 = smov %s685_s19 }
 0x1ba   : > { %s847_s19 = smov %s849_s23  ;;  %16 = sbr.rel (!%p14_p3) target bundleno = 4 (0x4), region = 77 }
 0x1bf   :  { %439 = vsyncpa [#allocation3], 1 }
 0x1c0   :  { %441 = vsyncpa [#allocation3 + $0x1], 1 }

// kernel: tpu_custom_call.1
= control target key start
LH: loop header
LB: loop body
LE: loop exit
PB: predicated region body
PF: predicated region fallthrough
CT: control target
= control target key end

     0   :  { %9 = vsyncpa [#allocation3], 0  ;;  %s836_s0 = inlined_call_operand.vmem [shape: f32[16,32], index: 0, kind: input, shape index: {}]   ;;  %s837_s1 = inlined_call_operand.vmem [shape: f32[32,4], index: 1, kind: input, shape index: {}]   ;;  %s838_s2 = inlined_call_operand.vmem [shape: f32[4,128], index: 2, kind: input, shape index: {}]   ;;  %s839_s3 = inlined_call_operand.vmem [shape: f32[1,128], index: 3, kind: input, shape index: {}]   ;;  %s840_s4 = inlined_call_operand.hbm [shape: f32[16,128], index: 4, kind: output, shape index: {}]  }
   0x1   :  { %11 = vsyncpa [#allocation3 + $0x1], 0  ;;  %s719_s15 = smov 0   ;;  %s721_s16 = smov 0  }
   0x2   :  { %s723_s17 = smov 0   ;;  %s725_s18 = smov 0  }
   0x3   :  { %s727_s19 = smov 0   ;;  %s729_s20 = smov 0  }
   0x4 LB: > { %s516_s21 = sadd.s32 4294967295, %s689_s20   ;;  %s517_s22 = sadd.s32 4294967294, %s689_s20   ;;  %s689_s20 = sphi %s729_s20, %s17_s20   ;;  %s685_s19 = sphi %s727_s19, %s847_s19   ;;  %s681_s18 = sphi %s725_s18, %s846_s18   ;;  %s677_s17 = sphi %s723_s17, %s845_s17   ;;  %s673_s16 = sphi %s721_s16, %s844_s16   ;;  %s669_s15 = sphi %s719_s15, %s843_s15  }
   0x5   : > { %s29_s23 = sadd.s32 1, %s685_s19  ;;  %s137_s24 = sadd.s32 1, %s677_s17 }
   0x6   : > { %p31_p0 = scmp.ge.s32.totalorder %s29_s23, 2  ;;  %p147_p1 = scmp.ne.s32.totalorder %s677_s17, %s673_s16 }
   0x7   : > { %p148_p2 = scmp.eq.s32.totalorder %s516_s21, 1  ;;  %p153_p3 = scmp.ne.s32.totalorder %s673_s16, %s669_s15 }
   0x8   : > { %s849_s23 = smov (%p31_p0, %s29_s23), 0  ;;  %p154_p5 = scmp.eq.s32.totalorder %s517_s22, 1 }
   0x9   : > { %p759_p4 = por %p148_p2, %p147_p1  ;;  %s132_s26 = ssub.s32 %s685_s19, %s849_s23 }
   0xa   : > { %p522_p6 = scmp.ge.s32.totalorder %s689_s20, 1  ;;  %p135_p7 = scmp.eq.s32.totalorder %s132_s26, 0 }
   0xb   : > { %p766_p8 = por %p154_p5, %p153_p3  ;;  %p195_p9 = scmp.lt.s32.totalorder %s689_s20, 3 }
   0xc   : > { %s772_s28 = scalar_select %p135_p7, %s677_s17, %s137_s24  }
   0xd   : > { %p196_p10 = pnand %p522_p6, %p195_p9 }
   0xe   : > { %p227_p11 = scmp.lt.s32.totalorder (!%p196_p10), %s681_s18, 1  ;;  %s224_s26 = sand.u32 (!%p196_p10), 1, %s673_s16  }
   0xf   : > { %199 = sbr.rel (%p196_p10) target bundleno = 432 (0x1b0), region = 36  ;;  %s523_s29 = sshll.u32 (!%p196_p10), %s224_s26, 3 }
  0x10   : > { %s530_s6 = sshll.u32 (!%p196_p10), %s681_s18, 7  ;;  %s407_s12 = scalar_lea.sflag (!%p196_p10), [#allocation3], %s224_s26 }
  0x11   : > { %s419_s11 = scalar_lea.hbm (!%p196_p10), %s840_s4, %s530_s6  ;;  %s693_s14 = smov (!%p196_p10), [#allocation2]  }
  0x14   : > { %v242_v0 = vld [vmem:[%s837_s1 + $0x18] sm:$0xff]  ;;  %v691_v1 = vmov 0.0   ;;  %v241_v2 = vld [vmem:[%s837_s1 + $0x10] sm:$0xff]  ;;  %vm692_vm0 = vmmov 0   ;;  %s228_s7 = scalar_select %p227_p11, %s681_s18, 1  ;;  %v240_v3 = vld [vmem:[%s837_s1 + $0x8] sm:$0xff] }
  0x15   : > { %540 = vmatprep.subr.mxu0 %v691_v1  ;;  %548 = vmatprep.mubr.msk.f32.mxu0 %vm692_vm0, %v691_v1  ;;  %v239_v4 = vld [vmem:[%s837_s1] sm:$0xff]  ;;  %vm243_vm1 = vcmask 261120   ;;  %vm322_vm2 = vcmask 1043456   ;;  %vm318_vm3 = vcmask 31744  }
  0x16   : > { %541 = vmatpush3.msra.mxu0 %v242_v0  ;;  %551 = vmatprep.subr.mxu1 %v691_v1  ;;  %s524_s10 = sshll.u32 %s228_s7, 3  ;;  %v317_v6 = vld [vmem:[%s838_s2] sm:$0xf]  ;;  %s226_s7 = scalar_lea.vmem [#allocation2], %s523_s29 }
  0x17   : > { %542 = vmatprep.subr.mxu0 %v691_v1  ;;  %553 = vmatprep.mubr.msk.f32.mxu1 %vm692_vm0, %v691_v1  ;;  %s230_s21 = scalar_lea.vmem %s836_s0, %s524_s10  ;;  %v528_v10 = vld [vmem:[%s839_s3] ss:$0 sm:$0xff]  ;;  %s421_s8 = sshll.u32 %s226_s7, 4  ;;  %s422_s8 = int_to_ptr.vmem [resolvable:$true] %s421_s8 }
  0x18   : > { %543 = vmatpush3.msra.mxu0 %v241_v2  ;;  %v238_v5 = vld [vmem:[%s230_s21] sm:$0xff]  ;;  %552 = vmatpush3.msk.msra.mxu1 %vm322_vm2, %v317_v6  ;;  %s613_s13 = scalar_lea.vmem %s422_s8, 128  ;;  %s617_s21 = sshll.u32 %s693_s14, 4  ;;  %s618_s21 = int_to_ptr.vmem [resolvable:$false] %s617_s21 }
  0x19   : > { %544 = vmatprep.subr.mxu0 %v691_v1  ;;  %p614_p12 = scmp.ne.s32.totalorder %s422_s8, %s613_s13  ;;  %s619_s18 = scalar_lea.vmem %s618_s21, 256 }
  0x1a   : > { %545 = vmatpush3.msra.mxu0 %v240_v3  ;;  %p620_p1 = scmp.lt.s32.totalorder %s422_s8, %s618_s21  ;;  %p621_p2 = scmp.lt.s32.totalorder %s619_s18, %s613_s13 }
  0x1b   : > { %546 = vmatprep.subr.mxu0 %v691_v1  ;;  %p615_p13 = pnand %p614_p12, %p759_p4 }
  0x1c   : > { %547 = vmatpush3.msra.mxu0 %v239_v4  ;;  %p622_p3 = por %p621_p2, %p620_p1 }
  0x1d   : > { %549 = vmatmul.mubr.msk.f32.vlgmr.msra.gmra.mxu0 %vm243_vm1, %v238_v5  ;;  %p616_p0 = pneg %p615_p13 }
  0x1f   : > { %p623_p5 = pnand %p622_p3, %p616_p0 }
  0xdd   : > { %v313_v7 = vpop.f32.mrf.mxu0 }
  0xde   : > { %554 = vmatmul.mubr.msk.f32.vlgmr.msra.gmra.mxu1 %vm318_vm3, %v313_v7 }
  0xdf   : > { %v550_v8 = vpop.f32.mrf.mxu0 }
 0x19e   : > { %v392_v9 = vpop.f32.mrf.mxu1 }
 0x19f   : > { %v396_v11 = vmul.f32 0.25, %v392_v9 }
 0x1a0   : > { %v555_v12 = vpop.f32.mrf.mxu1 }
 0x1a1   : > { %v404_v13 = vadd.f32 %v528_v10, %v396_v11 }
 0x1a3   : > { %405 = vst [vmem:[%s226_s7] sm:$0xff] %v404_v13 }
 0x1a4   : > { %626 = shalt.err (!%p623_p5)
}
 0x1a5   : > { %s627_s22 = scalar_lea.hbm %s419_s11, 128  ;;  %s631_s29 = scalar_lea.hbm %s840_s4, 256 }
 0x1a6   : > { %p628_p6 = scmp.ne.s32.totalorder %s419_s11, %s627_s22  ;;  %p632_p10 = scmp.lt.s32.totalorder %s419_s11, %s840_s4 }
 0x1a7   : > { %p633_p11 = scmp.lt.s32.totalorder %s631_s29, %s627_s22 }
 0x1a8   : > { %p629_p7 = pnand %p628_p6, %p759_p4 }
 0x1a9   : > { %p634_p12 = por %p633_p11, %p632_p10 }
 0x1aa   : > { %p630_p9 = pneg %p629_p7 }
 0x1ac   : > { %p635_p13 = pnand %p634_p12, %p630_p9 }
 0x1ae   : > { %638 = shalt.err (!%p635_p13)
}
 0x1af   : > { %556 = dma.vmem_to_hbm [thread:$0]  (%p759_p4), %s422_s8, 128, %s419_s11, %s407_s12  }
 0x1b0 PF: > { %p562_p0 = scmp.ge.s32.totalorder %s689_s20, 2  ;;  %s433_s6 = sand.u32 1, %s669_s15  }
 0x1b1   : > { %s434_s7 = scalar_lea.sflag [#allocation3], %s433_s6 }
 0x1b2   : > { %p559_p1 = pnand %p562_p0, %p766_p8 }
 0x1b4   : > { %p560_p2 = pneg %p559_p1 }
 0x1b6   : > { %664 = dma.done.wait (%p560_p2), %s434_s7, 128  }
 0x1b7   : > { %666 = vsyncadd (%p560_p2), %s434_s7, 4294967168  ;;  %s17_s20 = sadd.s32 1, %s689_s20   ;;  %s843_s15 = smov %s673_s16 }
 0x1b8   : > { %p14_p3 = scmp.ge.s32.totalorder %s17_s20, 4   ;;  %s844_s16 = smov %s677_s17 }
 0x1b9   : > { %s845_s17 = smov %s772_s28  ;;  %s846_s18 = smov %s685_s19 }
 0x1ba   : > { %s847_s19 = smov %s849_s23  ;;  %16 = sbr.rel (!%p14_p3) target bundleno = 4 (0x4), region = 77 }
 0x1bf   :  { %439 = vsyncpa [#allocation3], 1 }
 0x1c0   :  { %441 = vsyncpa [#allocation3 + $0x1], 1 }

</bundles_post_ra>
